<compile_context>
chip_gen: v6e
topology: v6e:2x2x1
jax: 0.10.0
libtpu: 0.0.40
codegen_flags: <defaults>
</compile_context>

<pallas_src>
import functools

import jax
import jax.numpy as jnp
from jax.experimental import pallas as pl
from jax.experimental.pallas import tpu as pltpu

LANE = 128
MAX_TILE_ROWS = 1024  # (1024, 128) f32 tile = 512 KiB; knee of the HBM roofline


def _bce_sum_kernel(x_ref, y_ref, o_ref, acc_ref, *, valid_rows, tile_rows,
                    mask_rows):
    """Accumulates elementwise BCE into a (tile_rows, 128) f32 VMEM accumulator;
    one cross-lane reduce + SMEM scalar write on the final grid step."""
    i = pl.program_id(0)

    @pl.when(i == 0)
    def _init():
        acc_ref[...] = jnp.zeros_like(acc_ref)

    x = x_ref[...].astype(jnp.float32)
    y = y_ref[...].astype(jnp.float32)
    # PyTorch BCELoss clamps the log terms at -100 (clamp BEFORE multiplying).
    log_x = jnp.maximum(jnp.log(x), -100.0)
    log_1mx = jnp.maximum(jnp.log(1.0 - x), -100.0)
    loss = -(y * log_x + (1.0 - y) * log_1mx)

    if mask_rows:
        # Last tile overshoots the array: zero out contributions from padded
        # (undefined-content) rows. Pure VPU work, hidden under the DMA shadow.
        row = i * tile_rows + jax.lax.broadcasted_iota(
            jnp.int32, (tile_rows, LANE), 0)
        loss = jnp.where(row < valid_rows, loss, 0.0)

    acc_ref[...] += loss

    @pl.when(i == pl.num_programs(0) - 1)
    def _finalize():
        o_ref[0, 0] = jnp.sum(acc_ref[...])


@functools.partial(jax.jit, static_argnames=("num_classes", "weights"))
def class_bce_loss(x, y, num_classes=3, weights=(0.4, 0.2, 0.4)):
    """Equivalent to ClassBCELoss.forward: mean-BCE scaled by sum(weights)."""
    total = x.size
    rows = -(-total // LANE)          # ceil(total / 128)
    pad = rows * LANE - total

    xf = x.reshape(-1)
    yf = y.reshape(-1)
    if pad:
        # Rare path (total % 128 != 0). x=1, y=1 padding contributes exactly 0.
        xf = jnp.pad(xf, (0, pad), constant_values=1)
        yf = jnp.pad(yf, (0, pad), constant_values=1)

    x2 = xf.reshape(rows, LANE)
    y2 = yf.reshape(rows, LANE)

    # Row tile: full extent for small inputs (single step), otherwise a large
    # 8-aligned tile with in-kernel masking of the final-tile overshoot.
    tile_rows = rows if rows <= MAX_TILE_ROWS else MAX_TILE_ROWS
    num_tiles = -(-rows // tile_rows)
    mask_rows = (num_tiles * tile_rows != rows)

    kernel = functools.partial(
        _bce_sum_kernel,
        valid_rows=rows,
        tile_rows=tile_rows,
        mask_rows=mask_rows,
    )

    bce_sum = pl.pallas_call(
        kernel,
        out_shape=jax.ShapeDtypeStruct((1, 1), jnp.float32),
        grid_spec=pltpu.PrefetchScalarGridSpec(
            num_scalar_prefetch=0,
            grid=(num_tiles,),
            in_specs=[
                pl.BlockSpec((tile_rows, LANE), lambda i: (i, 0)),
                pl.BlockSpec((tile_rows, LANE), lambda i: (i, 0)),
            ],
            out_specs=pl.BlockSpec(
                (1, 1), lambda i: (0, 0), memory_space=pltpu.SMEM
            ),
            scratch_shapes=[pltpu.VMEM((tile_rows, LANE), jnp.float32)],
        ),
        compiler_params=pltpu.CompilerParams(
            dimension_semantics=("arbitrary",)
        ),
    )(x2, y2)

    mean_bce = bce_sum[0, 0] / jnp.float32(total)
    # The PyTorch loop adds the SAME bce term num_classes times, each scaled
    # by weights[i]  ==>  mean_bce * sum(weights[:num_classes]).
    weight_sum = float(sum(weights[:num_classes]))
    return mean_bce * jnp.float32(weight_sum)


if __name__ == "__main__":
    key = jax.random.PRNGKey(0)
    kx, ky = jax.random.split(key)
    B, C, H, W = 2, 4, 16, 16  # NCHW, matching the PyTorch convention
    # x must be probabilities in (0, 1) (BCELoss expects sigmoid outputs).
    x = jax.nn.sigmoid(jax.random.normal(kx, (B, C, H, W), dtype=jnp.float32))
    # y are targets in [0, 1].
    y = (jax.random.uniform(ky, (B, C, H, W), dtype=jnp.float32) > 0.5).astype(
        jnp.float32
    )

    out = class_bce_loss(x, y, num_classes=3, weights=(0.4, 0.2, 0.4))
    out = jax.block_until_ready(out)

    # Pure-JAX reference check.
    log_x = jnp.maximum(jnp.log(x), -100.0)
    log_1mx = jnp.maximum(jnp.log(1.0 - x), -100.0)
    ref = jnp.mean(-(y * log_x + (1.0 - y) * log_1mx)) * (0.4 + 0.2 + 0.4)
    assert jnp.allclose(out, ref, rtol=1e-5, atol=1e-6), (out, ref)

    print("KERNEL_OK")
</pallas_src>

<mosaic_0001>
module attributes {stable_mosaic.version = 11 : i64} {
  func.func @_bce_sum_kernel(%arg0: i32, %arg1: memref<16x128xf32, #tpu.memory_space<vmem>>, %arg2: memref<16x128xf32, #tpu.memory_space<vmem>>, %arg3: memref<1x1xf32, #tpu.memory_space<smem>>, %arg4: memref<16x128xf32, #tpu.memory_space<vmem>>) attributes {dimension_semantics = [#tpu.dimension_semantics<arbitrary>], iteration_bounds = array<i64: 1>, scalar_prefetch = 0 : i64, scratch_operands = 1 : i64, tpu.core_type = #tpu.core_type<tc>, window_params = [{transform_indices = @transform_0, window_bounds = array<i64: 16, 128>}, {transform_indices = @transform_1, window_bounds = array<i64: 16, 128>}, {transform_indices = @transform_2, window_bounds = array<i64: 1, 1>}]} {
    %c0_i32 = arith.constant 0 : i32
    %0 = arith.cmpi eq, %arg0, %c0_i32 : i32
    %1 = arith.extui %0 : i1 to i32
    %c0_i32_0 = arith.constant 0 : i32
    %2 = arith.cmpi ne, %1, %c0_i32_0 : i32
    scf.if %2 {
      %cst_14 = arith.constant 0.000000e+00 : f32
      %26 = vector.broadcast %cst_14 : f32 to vector<16x128xf32>
      %c0_15 = arith.constant 0 : index
      %c0_16 = arith.constant 0 : index
      %27 = vector.load %arg4[%c0_15, %c0_16] : memref<16x128xf32, #tpu.memory_space<vmem>>, vector<16x128xf32>
      tpu.vector_store %arg4[%c0_15, %c0_16], %26 {strides = array<i32>} : memref<16x128xf32, #tpu.memory_space<vmem>>, vector<16x128xf32>,
    } else {
    }
    %c0 = arith.constant 0 : index
    %c0_1 = arith.constant 0 : index
    %3 = vector.load %arg1[%c0, %c0_1] : memref<16x128xf32, #tpu.memory_space<vmem>>, vector<16x128xf32>
    %c0_2 = arith.constant 0 : index
    %c0_3 = arith.constant 0 : index
    %4 = vector.load %arg2[%c0_2, %c0_3] : memref<16x128xf32, #tpu.memory_space<vmem>>, vector<16x128xf32>
    %5 = math.log %3 : vector<16x128xf32>
    %cst = arith.constant -1.000000e+02 : f32
    %6 = vector.broadcast %cst : f32 to vector<16x128xf32>
    %7 = arith.maximumf %5, %6 : vector<16x128xf32>
    %cst_4 = arith.constant 1.000000e+00 : f32
    %8 = vector.broadcast %cst_4 : f32 to vector<16x128xf32>
    %9 = arith.subf %8, %3 : vector<16x128xf32>
    %10 = math.log %9 : vector<16x128xf32>
    %cst_5 = arith.constant -1.000000e+02 : f32
    %11 = vector.broadcast %cst_5 : f32 to vector<16x128xf32>
    %12 = arith.maximumf %10, %11 : vector<16x128xf32>
    %13 = arith.mulf %4, %7 : vector<16x128xf32>
    %cst_6 = arith.constant 1.000000e+00 : f32
    %14 = vector.broadcast %cst_6 : f32 to vector<16x128xf32>
    %15 = arith.subf %14, %4 : vector<16x128xf32>
    %16 = arith.mulf %15, %12 : vector<16x128xf32>
    %17 = arith.addf %13, %16 : vector<16x128xf32>
    %cst_7 = arith.constant 0.000000e+00 : f32
    %18 = vector.broadcast %cst_7 : f32 to vector<16x128xf32>
    %19 = arith.subf %18, %17 : vector<16x128xf32>
    %c0_8 = arith.constant 0 : index
    %c0_9 = arith.constant 0 : index
    %20 = vector.load %arg4[%c0_8, %c0_9] : memref<16x128xf32, #tpu.memory_space<vmem>>, vector<16x128xf32>
    %21 = arith.addf %20, %19 : vector<16x128xf32>
    %c0_10 = arith.constant 0 : index
    %c0_11 = arith.constant 0 : index
    %22 = vector.load %arg4[%c0_10, %c0_11] : memref<16x128xf32, #tpu.memory_space<vmem>>, vector<16x128xf32>
    tpu.vector_store %arg4[%c0_10, %c0_11], %21 {strides = array<i32>} : memref<16x128xf32, #tpu.memory_space<vmem>>, vector<16x128xf32>,
    %c0_i32_12 = arith.constant 0 : i32
    %23 = arith.cmpi eq, %arg0, %c0_i32_12 : i32
    %24 = arith.extui %23 : i1 to i32
    %c0_i32_13 = arith.constant 0 : i32
    %25 = arith.cmpi ne, %24, %c0_i32_13 : i32
    scf.if %25 {
      %c0_14 = arith.constant 0 : index
      %c0_15 = arith.constant 0 : index
      %26 = vector.load %arg4[%c0_14, %c0_15] : memref<16x128xf32, #tpu.memory_space<vmem>>, vector<16x128xf32>
      %27 = vector.shape_cast %26 : vector<16x128xf32> to vector<1x16x128xf32>
      %cst_16 = arith.constant dense<0.000000e+00> : vector<1xf32>
      %28 = vector.multi_reduction <add>, %27, %cst_16 [1, 2] : vector<1x16x128xf32> to vector<1xf32>
      %29 = vector.shape_cast %28 : vector<1xf32> to vector<1x1x1xf32>
      %30 = vector.extract %29[0, 0, 0] : f32 from vector<1x1x1xf32>
      %c0_17 = arith.constant 0 : index
      %c0_18 = arith.constant 0 : index
      %31 = memref.load %arg3[%c0_17, %c0_18] : memref<1x1xf32, #tpu.memory_space<smem>>
      memref.store %30, %arg3[%c0_17, %c0_18] : memref<1x1xf32, #tpu.memory_space<smem>>
    } else {
    }
    return
  }
  func.func @transform_0(%arg0: i32) -> (i32, i32) {
    %c0_i32 = arith.constant 0 : i32
    %c0_i32_0 = arith.constant 0 : i32
    return %arg0, %c0_i32 : i32, i32
  }
  func.func @transform_1(%arg0: i32) -> (i32, i32) {
    %c0_i32 = arith.constant 0 : i32
    %c0_i32_0 = arith.constant 0 : i32
    return %arg0, %c0_i32 : i32, i32
  }
  func.func @transform_2(%arg0: i32) -> (i32, i32) {
    %c0_i32 = arith.constant 0 : i32
    %c0_i32_0 = arith.constant 0 : i32
    %c0_i32_1 = arith.constant 0 : i32
    return %c0_i32, %c0_i32_0 : i32, i32
  }
}

</mosaic_0001>

<bundles_post_ra>
// kernel: class_bce_loss.1
= control target key start
LH: loop header
LB: loop body
LE: loop exit
PB: predicated region body
PF: predicated region fallthrough
CT: control target
= control target key end

     0   :  { %s134_s0 = inlined_call_operand.vmem [shape: f32[16,128], index: 0, kind: input, shape index: {}]   ;;  %s135_s1 = inlined_call_operand.vmem [shape: f32[16,128], index: 1, kind: input, shape index: {}]   ;;  %s136_s2 = inlined_call_operand.hbm [shape: f32[1,1], index: 2, kind: output, shape index: {}]  }
   0x1   :  { %v18_v0 = vld [vmem:[%s134_s0] sm:$0xff]  ;;  %v19_v1 = vld [vmem:[%s134_s0 + $0x8] sm:$0xff] }
   0x2   :  { %85 = vlog2.f32 %v18_v0  ;;  %v28_v2 = vsub.f32 1.0, %v18_v0  ;;  %v29_v3 = vsub.f32 1.0, %v19_v1 }
   0x3   :  { %7 = vsyncpa [#allocation4], 0  ;;  %87 = vlog2.f32 %v19_v1  ;;  %v20_v5 = vld [vmem:[%s135_s1] sm:$0xff]  ;;  %v21_v7 = vld [vmem:[%s135_s1 + $0x8] sm:$0xff]  ;;  %s103_s1 = smov [#allocation3]  }
   0x4   :  { %89 = vlog2.f32 %v28_v2  ;;  %v38_v14 = vsub.f32 1.0, %v20_v5  ;;  %v39_v17 = vsub.f32 1.0, %v21_v7 }
   0x5   :  { %91 = vlog2.f32 %v29_v3 }
   0xf   :  { %v86_v4 = vpop.eup %85 }
  0x10   :  { %v88_v6 = vpop.eup %87  ;;  %v23_v8 = vmul.f32 0.6931472, %v86_v4 }
  0x11   :  { %v90_v9 = vpop.eup %89  ;;  %v25_v10 = vmul.f32 0.6931472, %v88_v6 }
  0x12   :  { %v92_v11 = vpop.eup %91  ;;  %v26_v12 = vmax.f32 %v23_v8, -100.0  ;;  %v31_v13 = vmul.f32 0.6931472, %v90_v9 }
  0x13   :  { %v27_v15 = vmax.f32 %v25_v10, -100.0  ;;  %v33_v16 = vmul.f32 0.6931472, %v92_v11 }
  0x14   :  { %v34_v18 = vmax.f32 %v31_v13, -100.0  ;;  %v36_v19 = vmul.f32 %v26_v12, %v20_v5 }
  0x15   :  { %v35_v20 = vmax.f32 %v33_v16, -100.0  ;;  %v37_v21 = vmul.f32 %v27_v15, %v21_v7 }
  0x16   :  { %v40_v22 = vmul.f32 %v38_v14, %v34_v18 }
  0x17   :  { %v41_v23 = vmul.f32 %v39_v17, %v35_v20 }
  0x18   :  { %v42_v24 = vadd.f32 %v40_v22, %v36_v19 }
  0x19   :  { %v43_v25 = vadd.f32 %v41_v23, %v37_v21 }
  0x1a   :  { %v44_v26 = vsub.f32 0.0, %v42_v24 }
  0x1b   :  { %v45_v27 = vsub.f32 0.0, %v43_v25 }
  0x1d   :  { %v57_v28 = vadd.f32 %v45_v27, %v44_v26 }
  0x1f   :  { %58 = vadd.xlane.f32.xlu0 %v57_v28 }
  0xa8   :  { %v59_v29 = vpop.xlane.xlu0 %58 }
  0xa9   :  { %v60_v30 = vrot.slane %v59_v29, 4 }
  0xab   :  { %v61_v31 = vadd.f32 %v60_v30, %v59_v29 }
  0xad   :  { %v62_v32 = vrot.slane %v61_v31, 2 }
  0xaf   :  { %v63_v33 = vadd.f32 %v62_v32, %v61_v31 }
  0xb1   :  { %v64_v34 = vrot.slane %v63_v33, 1 }
  0xb3   :  { %v65_v35 = vadd.f32 %v64_v34, %v63_v33 }
  0xb5   :  { %82 = vpush %v65_v35 }
  0xe6   :  { %s83_s0 = spop %82 }
  0xe7   :  { %68 = sst [smem:[#allocation3]] %s83_s0 }
  0xe8   :  { %76 = dma.smem_to_hbm %s103_s1, 16, %s136_s2, [#allocation4]  }
  0xe9   :  { %101 = dma.done.wait [#allocation4], 16  }
  0xea   :  { %102 = vsyncadd [#allocation4], 4294967280 }
  0xeb   :  { %80 = sfence }
  0xec   :  { %81 = vsyncpa [#allocation4], 1 }

</bundles_post_ra>
